<compile_context>
chip_gen: v6e
topology: v6e:2x2x1
jax: 0.10.0
libtpu: 0.0.40
codegen_flags: <defaults>
</compile_context>

<pallas_src>
import jax
import jax.numpy as jnp
from jax.experimental import pallas as pl
from jax.experimental.pallas import tpu as pltpu

_LANES = 128       # vreg lane width (fast axis)
_SUBLANES = 8      # vreg sublane count (slow axis)


def _linear_kernel(x_ref, w_ref, b_ref, o_ref):
    # Scalar weight/bias come from SMEM; broadcast happens in the VPU FMA.
    w = w_ref[0, 0]
    b = b_ref[0, 0]
    o_ref[...] = x_ref[...] * w + b


def _linear1_pallas(x, w, b, *, max_tile_rows=1024):
    """Lane-dense streaming kernel for y = x * w + b, x: [N, 1] -> [N, 1]."""
    n, in_f = x.shape
    assert in_f == 1 and w.shape == (1, 1) and b.shape == (1,)
    dtype = x.dtype

    # Flatten the N scalars onto the 128-lane axis: [N, 1] -> [rows, 128].
    rows = -(-n // _LANES)                        # ceil(N / 128)
    rows = -(-rows // _SUBLANES) * _SUBLANES      # sublane-align (multiple of 8)
    tile_rows = min(max_tile_rows, rows)          # tile_rows is a multiple of 8
    rows_padded = -(-rows // tile_rows) * tile_rows
    n_pad = rows_padded * _LANES

    x_flat = x.reshape(-1)
    if n_pad != n:
        x_flat = jnp.pad(x_flat, (0, n_pad - n))
    x2d = x_flat.reshape(rows_padded, _LANES)

    grid = (rows_padded // tile_rows,)
    y2d = pl.pallas_call(
        _linear_kernel,
        out_shape=jax.ShapeDtypeStruct((rows_padded, _LANES), dtype),
        grid=grid,
        in_specs=[
            pl.BlockSpec((tile_rows, _LANES), lambda i: (i, 0)),        # x tile
            pl.BlockSpec(memory_space=pltpu.MemorySpace.SMEM),          # w (1,1)
            pl.BlockSpec(memory_space=pltpu.MemorySpace.SMEM),          # b (1,1)
        ],
        out_specs=pl.BlockSpec((tile_rows, _LANES), lambda i: (i, 0)),
        compiler_params=pltpu.CompilerParams(
            dimension_semantics=("parallel",)),   # 2 TCs on v7x; no-op v5e/v6e
    )(x2d, w.astype(dtype), b.reshape(1, 1).astype(dtype))

    return y2d.reshape(-1)[:n].reshape(n, 1)


def linear1_forward(x, w, b, *, pallas_min_n=1024, max_tile_rows=1024):
    """Forward of torch.nn.Linear(1, 1): y = x @ W^T + b.

    For tiny N the pallas_call dispatch + DMA setup dominates, so fall back to
    a plain fused XLA expression; otherwise use the lane-dense Pallas kernel.
    """
    n = x.shape[0]
    if n < pallas_min_n:
        return x * w[0, 0] + b[0]
    return _linear1_pallas(x, w, b, max_tile_rows=max_tile_rows)


if __name__ == "__main__":
    key = jax.random.PRNGKey(0)
    kx, kw, kb, kx2, kx3 = jax.random.split(key, 5)

    # Parameters mimicking torch.nn.Linear(1, 1) init (uniform, fan_in=1).
    w = jax.random.uniform(kw, (1, 1), jnp.float32, minval=-1.0, maxval=1.0)
    b = jax.random.uniform(kb, (1,), jnp.float32, minval=-1.0, maxval=1.0)

    # 1) Kernel path, single tile: N not a multiple of 128 (exercises padding
    #    and slice-back).
    x_a = jax.random.normal(kx, (300, 1), jnp.float32)
    y_a = _linear1_pallas(x_a, w, b)
    jax.block_until_ready(y_a)
    y_a_ref = x_a @ w.T + b
    assert y_a.shape == (300, 1)
    assert jnp.allclose(y_a, y_a_ref, atol=1e-6), "single-tile kernel mismatch"

    # 2) Kernel path, multi-step grid: small row tiles force several grid
    #    iterations (exercises index_map + pipelining).
    x_b = jax.random.normal(kx2, (2000, 1), jnp.float32)
    y_b = _linear1_pallas(x_b, w, b, max_tile_rows=8)
    jax.block_until_ready(y_b)
    y_b_ref = x_b @ w.T + b
    assert y_b.shape == (2000, 1)
    assert jnp.allclose(y_b, y_b_ref, atol=1e-6), "multi-tile kernel mismatch"

    # 3) Dispatch path: tiny batch like the original module usage (plain XLA).
    x_c = jax.random.normal(kx3, (2, 1), jnp.float32)
    y_c = linear1_forward(x_c, w, b)
    jax.block_until_ready(y_c)
    y_c_ref = x_c @ w.T + b
    assert y_c.shape == (2, 1)
    assert jnp.allclose(y_c, y_c_ref, atol=1e-6), "small-N fallback mismatch"

    print("KERNEL_OK")
</pallas_src>

<mosaic_0001>
module attributes {stable_mosaic.version = 11 : i64} {
  func.func @_linear_kernel(%arg0: i32, %arg1: memref<8x128xf32, #tpu.memory_space<vmem>>, %arg2: memref<1x1xf32, #tpu.memory_space<smem>>, %arg3: memref<1x1xf32, #tpu.memory_space<smem>>, %arg4: memref<8x128xf32, #tpu.memory_space<vmem>>) attributes {dimension_semantics = [#tpu.dimension_semantics<parallel>], iteration_bounds = array<i64: 1>, scalar_prefetch = 0 : i64, scratch_operands = 0 : i64, tpu.core_type = #tpu.core_type<tc>, window_params = [{transform_indices = @transform_0, window_bounds = array<i64: 8, 128>}, {transform_indices = @transform_1, window_bounds = array<i64: 1, 1>}, {transform_indices = @transform_2, window_bounds = array<i64: 1, 1>}, {transform_indices = @transform_3, window_bounds = array<i64: 8, 128>}]} {
    %c0 = arith.constant 0 : index
    %c0_0 = arith.constant 0 : index
    %0 = memref.load %arg2[%c0, %c0_0] : memref<1x1xf32, #tpu.memory_space<smem>>
    %c0_1 = arith.constant 0 : index
    %c0_2 = arith.constant 0 : index
    %1 = memref.load %arg3[%c0_1, %c0_2] : memref<1x1xf32, #tpu.memory_space<smem>>
    %c0_3 = arith.constant 0 : index
    %c0_4 = arith.constant 0 : index
    %2 = vector.load %arg1[%c0_3, %c0_4] : memref<8x128xf32, #tpu.memory_space<vmem>>, vector<8x128xf32>
    %3 = vector.broadcast %0 : f32 to vector<8x128xf32>
    %4 = arith.mulf %2, %3 : vector<8x128xf32>
    %5 = vector.broadcast %1 : f32 to vector<8x128xf32>
    %6 = arith.addf %4, %5 : vector<8x128xf32>
    %c0_5 = arith.constant 0 : index
    %c0_6 = arith.constant 0 : index
    %7 = vector.load %arg4[%c0_5, %c0_6] : memref<8x128xf32, #tpu.memory_space<vmem>>, vector<8x128xf32>
    tpu.vector_store %arg4[%c0_5, %c0_6], %6 {strides = array<i32>} : memref<8x128xf32, #tpu.memory_space<vmem>>, vector<8x128xf32>,
    return
  }
  func.func @transform_0(%arg0: i32) -> (i32, i32) {
    %c0_i32 = arith.constant 0 : i32
    %c0_i32_0 = arith.constant 0 : i32
    return %arg0, %c0_i32 : i32, i32
  }
  func.func @transform_1(%arg0: i32) -> (i32, i32) {
    %c0_i32 = arith.constant 0 : i32
    %c0_i32_0 = arith.constant 0 : i32
    %c0_i32_1 = arith.constant 0 : i32
    return %c0_i32, %c0_i32_0 : i32, i32
  }
  func.func @transform_2(%arg0: i32) -> (i32, i32) {
    %c0_i32 = arith.constant 0 : i32
    %c0_i32_0 = arith.constant 0 : i32
    %c0_i32_1 = arith.constant 0 : i32
    return %c0_i32, %c0_i32_0 : i32, i32
  }
  func.func @transform_3(%arg0: i32) -> (i32, i32) {
    %c0_i32 = arith.constant 0 : i32
    %c0_i32_0 = arith.constant 0 : i32
    return %arg0, %c0_i32 : i32, i32
  }
}

</mosaic_0001>

<bundles_post_ra>
// kernel: tpu_custom_call.1
= control target key start
LH: loop header
LB: loop body
LE: loop exit
PB: predicated region body
PF: predicated region fallthrough
CT: control target
= control target key end

     0   :  { %10 = vsyncpa [#allocation5], 0  ;;  %s132_s0 = inlined_call_operand.hbm [shape: f32[8,128], index: 0, kind: input, shape index: {}]   ;;  %s133_s1 = inlined_call_operand.<no memory space> [shape: f32[1,1], index: 1, kind: input, shape index: {}]   ;;  %s134_s2 = inlined_call_operand.<no memory space> [shape: f32[1,1], index: 2, kind: input, shape index: {}]   ;;  %s135_s3 = inlined_call_operand.hbm [shape: f32[8,128], index: 3, kind: output, shape index: {}]  }
   0x1   :  { %11 = vsyncpa [#allocation6], 0  ;;  %s98_s12 = smov [#allocation4]  }
   0x2   :  { %s18_s13 = sshll.u32 %s98_s12, 4  ;;  %s19_s13 = int_to_ptr.vmem [resolvable:$true] %s18_s13 }
   0x3   :  { %s62_s14 = scalar_lea.vmem %s19_s13, 128  ;;  %p67_p1 = scmp.lt.s32.totalorder %s19_s13, %s19_s13 }
   0x4   :  { %p63_p0 = scmp.ne.s32.totalorder %s19_s13, %s62_s14  ;;  %p68_p2 = scmp.lt.s32.totalorder %s62_s14, %s62_s14 }
   0x6   :  { %p69_p3 = por %p68_p2, %p67_p1 }
   0x8   :  { %p70_p4 = pnand %p69_p3, %p63_p0 }
   0xa   :  { %73 = shalt.err (!%p70_p4)
}
   0xb   :  { %21 = dma.hbm_to_vmem [thread:$0]  %s132_s0, 128, %s19_s13, [#allocation5]  }
   0xc   :  { %94 = dma.done.wait [#allocation5], 128  }
   0xd   :  { %95 = vsyncadd [#allocation5], 4294967168  ;;  %v32_v0 = vstv %s133_s1  ;;  %v31_v1 = vld [vmem:[#allocation4] sm:$0xff]  ;;  %v34_v2 = vstv %s134_s2  ;;  %s99_s21 = smov [#allocation7]  }
   0xe   :  { %s43_s22 = sshll.u32 %s99_s21, 4  ;;  %v33_v3 = vmul.f32 %v32_v0, %v31_v1  ;;  %s44_s22 = int_to_ptr.vmem [resolvable:$true] %s43_s22 }
   0xf   :  { %s74_s23 = scalar_lea.vmem %s44_s22, 128  ;;  %p79_p6 = scmp.lt.s32.totalorder %s44_s22, %s44_s22 }
  0x10   :  { %v35_v4 = vadd.f32 %v34_v2, %v33_v3  ;;  %p75_p5 = scmp.ne.s32.totalorder %s44_s22, %s74_s23  ;;  %p80_p7 = scmp.lt.s32.totalorder %s74_s23, %s74_s23 }
  0x12   :  { %36 = vst [vmem:[#allocation7] sm:$0xff] %v35_v4  ;;  %p81_p8 = por %p80_p7, %p79_p6 }
  0x14   :  { %p82_p9 = pnand %p81_p8, %p75_p5 }
  0x16   :  { %85 = shalt.err (!%p82_p9)
}
  0x17   :  { %46 = dma.vmem_to_hbm [thread:$0]  %s44_s22, 128, %s135_s3, [#allocation6]  }
  0x18   :  { %96 = dma.done.wait [#allocation6], 128  }
  0x19   :  { %97 = vsyncadd [#allocation6], 4294967168 }
  0x1a   :  { %50 = vsyncpa [#allocation5], 1 }
  0x1b   :  { %51 = vsyncpa [#allocation6], 1 }

</bundles_post_ra>
